<compile_context>
chip_gen: v7x
topology: tpu7x:2x2x1
jax: 0.10.0
libtpu: 0.0.40
codegen_flags: <defaults>
</compile_context>

<pallas_src>
import jax
import jax.numpy as jnp
from jax.experimental import pallas as pl
from jax.experimental.pallas import tpu as pltpu


def _round_up(n, m):
    return ((n + m - 1) // m) * m


def mylinear_kernel(x_ref, w2s_ref, b2_ref, o_ref):
    # Upcast in VMEM (cheap, hidden under DMA); required on v5e (f32-only VPU/EUP).
    x = x_ref[...].astype(jnp.float32)

    # (sigmoid(x) - 0.5) * 2 == tanh(x / 2): single EUP op.
    pre = jnp.tanh(0.5 * x)

    # hidden_1: Linear(F -> H) with ones weight / zero bias => row-sum of pre,
    # broadcast over H. Folded with the out linear:
    #   h @ W2.T == s * rowsum_H(W2)   (rank-1; pure VPU broadcast-multiply)
    s = jnp.sum(pre, axis=-1, keepdims=True)          # [tb, 1]
    o = s * w2s_ref[...] + b2_ref[...]                # [tb, O]

    # Final sigmoid over the real O lanes only; tight [tb, O] store.
    o_ref[...] = jax.nn.sigmoid(o).astype(o_ref.dtype)


def prepare_params(w2, b2):
    """One-time (weight-init-time) algebraic fold of the out linear.

    Since hidden_1 has weight=ones / bias=zeros, h is the row-sum of the
    pre-activation broadcast over H, so h @ W2.T == s * W2.sum(axis=1).
    NOTE: this fold (and the row-sum in the kernel) assumes hidden_1 keeps its
    ones/zeros initialization, exactly as in the module's __init__.
    """
    w2_rowsum = jnp.sum(w2.astype(jnp.float32), axis=1)[None, :]   # [1, O]
    b2_row = b2.astype(jnp.float32)[None, :]                       # [1, O]
    return w2_rowsum, b2_row


def mylinear_forward(x, w2_rowsum, b2_row):
    """x: [B, F] (any float dtype); w2_rowsum, b2_row: [1, O]  ->  [B, O] f32."""
    B, F = x.shape
    O = w2_rowsum.shape[1]

    # Batch tiling:
    #  - small B: single whole-batch tile (block dims == full dims).
    #  - larger B: at least 2 grid steps (v7x dual-TensorCore sharding via
    #    "parallel"), 8-row aligned, capped at 1024 rows for HBM-roofline
    #    efficiency. VMEM per tile at F=32 is ~a few hundred KiB: trivial.
    if B <= 64:
        tb = B
    else:
        tb = min(_round_up(pl.cdiv(B, 2), 8), 1024)
    grid = (pl.cdiv(B, tb),)

    itemsize = jnp.dtype(x.dtype).itemsize
    bytes_accessed = itemsize * B * F + 4 * (2 * O + B * O)
    flops = 4 * B * F + 3 * B * O
    transcendentals = B * F + B * O

    out = pl.pallas_call(
        mylinear_kernel,
        out_shape=jax.ShapeDtypeStruct((B, O), jnp.float32),
        grid=grid,
        in_specs=[
            pl.BlockSpec((tb, F), lambda i: (i, 0)),   # streamed x tile
            pl.BlockSpec((1, O), lambda i: (0, 0)),    # resident rowsum(W2)
            pl.BlockSpec((1, O), lambda i: (0, 0)),    # resident bias
        ],
        out_specs=pl.BlockSpec((tb, O), lambda i: (i, 0)),
        compiler_params=pltpu.CompilerParams(
            dimension_semantics=("parallel",),
            vmem_limit_bytes=32 * 1024 * 1024,
        ),
        cost_estimate=pl.CostEstimate(
            flops=flops,
            transcendentals=transcendentals,
            bytes_accessed=bytes_accessed,
        ),
    )(x, w2_rowsum, b2_row)
    return out


if __name__ == "__main__":
    # Small shapes implied by the module: [batch, n_feature]
    batch, n_feature, n_hidden, n_output = 8, 32, 64, 16

    key = jax.random.PRNGKey(0)
    kx, kw2, kb2 = jax.random.split(key, 3)

    x = jax.random.normal(kx, (batch, n_feature), dtype=jnp.float32)

    # hidden_1 parameters exactly as in __init__: ones weight, zeros bias.
    # (Folded into the kernel as a row-sum; kept here for the reference math.)
    w1 = jnp.ones((n_hidden, n_feature), dtype=jnp.float32)
    b1 = jnp.zeros((n_hidden,), dtype=jnp.float32)

    # out linear: deterministic synthetic init mimicking PyTorch default scale.
    bound = 1.0 / jnp.sqrt(jnp.float32(n_hidden))
    w2 = jax.random.uniform(kw2, (n_output, n_hidden), jnp.float32,
                            minval=-bound, maxval=bound)
    b2 = jax.random.uniform(kb2, (n_output,), jnp.float32,
                            minval=-bound, maxval=bound)

    # One-time fold (rowsum of W2), then the kernel call.
    w2_rowsum, b2_row = prepare_params(w2, b2)
    out = mylinear_forward(x, w2_rowsum, b2_row)
    out = jax.block_until_ready(out)

    # Sanity check against a pure-JAX reference of the original module math.
    pre = (jax.nn.sigmoid(x) - 0.5) * 2.0
    ref = jax.nn.sigmoid((pre @ w1.T + b1) @ w2.T + b2)
    assert out.shape == (batch, n_output)
    assert jnp.allclose(out, ref, atol=1e-5, rtol=1e-5)

    # TODO(synk): nn.Dropout and BatchNorm1d exist in __init__ but are unused in forward; omitted.
    print("KERNEL_OK")
</pallas_src>

<mosaic_0001>
module attributes {stable_mosaic.version = 11 : i64} {
  func.func @mylinear_kernel(%arg0: i32, %arg1: memref<8x32xf32, #tpu.memory_space<vmem>>, %arg2: memref<1x16xf32, #tpu.memory_space<vmem>>, %arg3: memref<1x16xf32, #tpu.memory_space<vmem>>, %arg4: memref<8x16xf32, #tpu.memory_space<vmem>>) attributes {dimension_semantics = [#tpu.dimension_semantics<parallel>], iteration_bounds = array<i64: 1>, scalar_prefetch = 0 : i64, scratch_operands = 0 : i64, tpu.core_type = #tpu.core_type<tc>, window_params = [{transform_indices = @transform_0, window_bounds = array<i64: 8, 32>}, {pipeline_mode = #tpu.pipeline_mode<synchronous>, transform_indices = @transform_1, window_bounds = array<i64: 1, 16>}, {pipeline_mode = #tpu.pipeline_mode<synchronous>, transform_indices = @transform_2, window_bounds = array<i64: 1, 16>}, {transform_indices = @transform_3, window_bounds = array<i64: 8, 16>}]} {
    %c0 = arith.constant 0 : index
    %c0_0 = arith.constant 0 : index
    %0 = vector.load %arg1[%c0, %c0_0] : memref<8x32xf32, #tpu.memory_space<vmem>>, vector<8x32xf32>
    %cst = arith.constant 5.000000e-01 : f32
    %1 = vector.broadcast %cst : f32 to vector<8x32xf32>
    %2 = arith.mulf %1, %0 : vector<8x32xf32>
    %3 = math.tanh %2 : vector<8x32xf32>
    %cst_1 = arith.constant dense<0.000000e+00> : vector<8xf32>
    %4 = vector.multi_reduction <add>, %3, %cst_1 [1] : vector<8x32xf32> to vector<8xf32>
    %5 = vector.shape_cast %4 : vector<8xf32> to vector<8x1xf32>
    %c0_2 = arith.constant 0 : index
    %c0_3 = arith.constant 0 : index
    %6 = vector.load %arg2[%c0_2, %c0_3] : memref<1x16xf32, #tpu.memory_space<vmem>>, vector<1x16xf32>
    %7 = vector.broadcast %5 : vector<8x1xf32> to vector<8x16xf32>
    %8 = vector.broadcast %6 : vector<1x16xf32> to vector<8x16xf32>
    %9 = arith.mulf %7, %8 : vector<8x16xf32>
    %c0_4 = arith.constant 0 : index
    %c0_5 = arith.constant 0 : index
    %10 = vector.load %arg3[%c0_4, %c0_5] : memref<1x16xf32, #tpu.memory_space<vmem>>, vector<1x16xf32>
    %11 = vector.broadcast %10 : vector<1x16xf32> to vector<8x16xf32>
    %12 = arith.addf %9, %11 : vector<8x16xf32>
    %13 = arith.negf %12 : vector<8x16xf32>
    %14 = math.exp %13 : vector<8x16xf32>
    %cst_6 = arith.constant 1.000000e+00 : f32
    %15 = vector.broadcast %cst_6 : f32 to vector<8x16xf32>
    %16 = arith.addf %15, %14 : vector<8x16xf32>
    %17 = arith.divf %15, %16 : vector<8x16xf32>
    %c0_7 = arith.constant 0 : index
    %c0_8 = arith.constant 0 : index
    %18 = vector.load %arg4[%c0_7, %c0_8] : memref<8x16xf32, #tpu.memory_space<vmem>>, vector<8x16xf32>
    tpu.vector_store %arg4[%c0_7, %c0_8], %17 {strides = array<i32>} : memref<8x16xf32, #tpu.memory_space<vmem>>, vector<8x16xf32>,
    return
  }
  func.func @transform_0(%arg0: i32) -> (i32, i32) {
    %c0_i32 = arith.constant 0 : i32
    %c0_i32_0 = arith.constant 0 : i32
    return %arg0, %c0_i32 : i32, i32
  }
  func.func @transform_1(%arg0: i32) -> (i32, i32) {
    %c0_i32 = arith.constant 0 : i32
    %c0_i32_0 = arith.constant 0 : i32
    %c0_i32_1 = arith.constant 0 : i32
    return %c0_i32, %c0_i32_0 : i32, i32
  }
  func.func @transform_2(%arg0: i32) -> (i32, i32) {
    %c0_i32 = arith.constant 0 : i32
    %c0_i32_0 = arith.constant 0 : i32
    %c0_i32_1 = arith.constant 0 : i32
    return %c0_i32, %c0_i32_0 : i32, i32
  }
  func.func @transform_3(%arg0: i32) -> (i32, i32) {
    %c0_i32 = arith.constant 0 : i32
    %c0_i32_0 = arith.constant 0 : i32
    return %arg0, %c0_i32 : i32, i32
  }
}

</mosaic_0001>

<bundles_post_ra>
// kernel: tpu_custom_call.1
= control target key start
LH: loop header
LB: loop body
LE: loop exit
PB: predicated region body
PF: predicated region fallthrough
CT: control target
= control target key end

     0   :  { %8 = vsyncpa [#allocation3], 0  ;;  %s184_s0 = inlined_call_operand.hbm [shape: f32[8,32], index: 0, kind: input, shape index: {}]   ;;  %s185_s1 = inlined_call_operand.vmem [shape: f32[1,16], index: 1, kind: input, shape index: {}]   ;;  %s186_s2 = inlined_call_operand.vmem [shape: f32[1,16], index: 2, kind: input, shape index: {}]   ;;  %s187_s3 = inlined_call_operand.hbm [shape: f32[8,16], index: 3, kind: output, shape index: {}]  }
   0x1   :  { %9 = vsyncpa [#allocation4], 0  ;;  %s132_s12 = smov [#allocation2]   ;;  %s84_s16 = scalar_lea.hbm %s184_s0, 128 }
   0x2   :  { %s16_s13 = sshll.u32 %s132_s12, 4  ;;  %p85_p0 = scmp.ne.s32.totalorder %s184_s0, %s84_s16  ;;  %s17_s13 = int_to_ptr.vmem [resolvable:$true] %s16_s13 }
   0x3   :  { %p88_p1 = scmp.lt.u32.totalorder %s84_s16, %s184_s0 }
   0x5   :  { %p90_p2 = pnand %p88_p1, %p85_p0 }
   0x7   :  { %93 = shalt.err (!%p90_p2)
}
   0x8   :  { %s94_s21 = scalar_lea.vmem %s17_s13, 128  ;;  %p99_p4 = scmp.lt.s32.totalorder %s17_s13, %s17_s13 }
   0x9   :  { %p95_p3 = scmp.ne.s32.totalorder %s17_s13, %s94_s21  ;;  %p100_p5 = scmp.lt.s32.totalorder %s94_s21, %s94_s21 }
   0xb   :  { %p101_p6 = por %p100_p5, %p99_p4 }
   0xd   :  { %p102_p7 = pnand %p101_p6, %p95_p3 }
   0xf   :  { %105 = shalt.err (!%p102_p7)
}
  0x10   :  { %19 = dma.hbm_to_vmem [thread:$0]  %s184_s0, 128, %s17_s13, [#allocation3]  }
  0x11   :  { %128 = dma.done.wait [#allocation3], 128  }
  0x12   :  { %129 = vsyncadd [#allocation3], 4294967168  ;;  %v27_v0 = vld [vmem:[#allocation2] sm:$0xff]  ;;  %vm30_vm0 = vcmask 261120   ;;  %s133_s0 = smov [#allocation5]   ;;  %vm56_vm1 = vcmask 130048  }
  0x13   :  { %v28_v1 = vmul.f32 0.5, %v27_v0  ;;  %v73_v4 = vld [vmem:[%s185_s1] ss:$0 sm:$0xff]  ;;  %s64_s28 = sshll.u32 %s133_s0, 4  ;;  %s65_s28 = int_to_ptr.vmem [resolvable:$true] %s64_s28 }
  0x14   :  { %v74_v6 = vld [vmem:[%s186_s2] ss:$0 sm:$0xff]  ;;  %s106_s29 = scalar_lea.vmem %s65_s28, 128  ;;  %p111_p9 = scmp.lt.s32.totalorder %s65_s28, %s65_s28 }
  0x15   :  { %78 = vtanh.f32 %v28_v1  ;;  %p107_p8 = scmp.ne.s32.totalorder %s65_s28, %s106_s29  ;;  %p112_p10 = scmp.lt.s32.totalorder %s106_s29, %s106_s29 }
  0x17   :  { %p113_p11 = por %p112_p10, %p111_p9 }
  0x19   :  { %p114_p12 = pnand %p113_p11, %p107_p8 }
  0x1f   :  { %v79_v2 = vpop.eup %78 }
  0x20   :  { %v31_v3 = vsel %vm30_vm0, %v79_v2, 0.0 }
  0x21   :  { %32 = vadd.xlane.f32.xlu0 %v31_v3 }
  0xae   :  { %v33_v5 = vpop.xlane.xlu0 %32 }
  0xaf   :  { %v41_v7 = vmul.f32 %v73_v4, %v33_v5 }
  0xb1   :  { %v49_v8 = vadd.f32 %v74_v6, %v41_v7 }
  0xb3   :  { %v75_v9 = vmul.f32 -1.442695, %v49_v8 }
  0xb5   :  { %80 = vpow2.f32 %v75_v9 }
  0xbf   :  { %v81_v10 = vpop.eup %80 }
  0xc0   :  { %v53_v11 = vadd.f32 1.0, %v81_v10 }
  0xc2   :  { %82 = vrcp.f32 %v53_v11 }
  0xcc   :  { %v83_v12 = vpop.eup %82 }
  0xcd   :  { %57 = vst.msk [vmem:[#allocation5] sm:$0xff] %vm56_vm1, %v83_v12 }
  0xce   :  { %117 = shalt.err (!%p114_p12)
}
  0xcf   :  { %s118_s30 = scalar_lea.hbm %s187_s3, 128 }
  0xd0   :  { %p119_p13 = scmp.ne.s32.totalorder %s187_s3, %s118_s30  ;;  %p122_p0 = scmp.lt.u32.totalorder %s118_s30, %s187_s3 }
  0xd2   :  { %p124_p1 = pnand %p122_p0, %p119_p13 }
  0xd4   :  { %127 = shalt.err (!%p124_p1)
}
  0xd5   :  { %67 = dma.vmem_to_hbm [thread:$0]  %s65_s28, 128, %s187_s3, [#allocation4]  }
  0xd6   :  { %130 = dma.done.wait [#allocation4], 128  }
  0xd7   :  { %131 = vsyncadd [#allocation4], 4294967168 }
  0xd8   :  { %71 = vsyncpa [#allocation3], 1 }
  0xd9   :  { %72 = vsyncpa [#allocation4], 1 }

</bundles_post_ra>
